<compile_context>
chip_gen: v7x
topology: tpu7x:2x2x1
jax: 0.10.0
libtpu: 0.0.40
codegen_flags: <defaults>
</compile_context>

<pallas_src>
import functools

import jax
import jax.numpy as jnp
from jax.experimental import pallas as pl
from jax.experimental.pallas import tpu as pltpu


def ensemble_head_kernel(*refs, ensemble_size: int, action_dim: int):
    """agg = sum_e spec_e @ w_e + b; mu = tanh(agg[:, :A]); log_sigma = clamp(agg[:, A:], -20, 2)."""
    E, A = ensemble_size, action_dim
    spec_refs = refs[:E]                              # E x (TB, 2A)
    w_ref, b_ref, mu_ref, ls_ref = refs[E:E + 4]      # (E, 2A, 2A), (1, 2A), (TB, A), (TB, A)

    # E tiny MXU matmuls accumulated in f32 — no concat / lane gather in-kernel.
    agg = jnp.dot(spec_refs[0][...], w_ref[0], preferred_element_type=jnp.float32)
    for e in range(1, E):
        agg = agg + jnp.dot(spec_refs[e][...], w_ref[e], preferred_element_type=jnp.float32)
    agg = agg + b_ref[...].astype(jnp.float32)        # (TB, 2A)

    # Lane-split epilogue: A < 128 keeps both slices inside one (8,128) tile,
    # so these lower to masked stores — no relayout, no mask select needed.
    mu_ref[...] = jnp.tanh(agg[:, :A]).astype(mu_ref.dtype)
    ls_ref[...] = jnp.clip(agg[:, A:], -20.0, 2.0).astype(ls_ref.dtype)


def prepare_mlp_params(mlp_weight, mlp_bias, action_dim: int, ensemble_size: int,
                       compute_dtype=jnp.bfloat16):
    """Fold PyTorch's stack(dim=-1)+view+cat feature permutation into E weight blocks.

    PyTorch feature layout:
        feats[b, a*E + e]         = out_e[b, a]        (mu block,        a < A)
        feats[b, A*E + a*E + e]   = out_e[b, A + a]    (log_sigma block)
    Kernel layout: agg[b, j] = sum_e sum_c out_e[b, c] * w_blocks[e, c, j] + bias[j],
    so we permute W (2A, 2A*E) -> w_blocks (E, 2A, 2A) once at init.
    """
    A, E = action_dim, ensemble_size
    assert mlp_weight.shape == (2 * A, 2 * A * E)
    w_mu = mlp_weight[:, :A * E].reshape(2 * A, A, E)   # [j, a, e] = W[j, a*E + e]
    w_ls = mlp_weight[:, A * E:].reshape(2 * A, A, E)   # [j, a, e] = W[j, A*E + a*E + e]
    w_perm = jnp.concatenate([w_mu, w_ls], axis=1)      # [j, c, e], c in [0, 2A)
    w_perm = jnp.transpose(w_perm, (2, 1, 0))           # [e, c, j]
    return {
        "w_blocks": w_perm.astype(compute_dtype),       # (E, 2A, 2A), MXU-native dtype
        "bias": mlp_bias.reshape(1, 2 * A).astype(jnp.float32),
    }


def _pick_block_rows(batch: int, sublane: int, target: int = 512) -> int:
    """Largest row block <= target that is a multiple of `sublane` and divides batch."""
    if batch <= target:
        return batch
    tb = (target // sublane) * sublane
    while tb >= sublane:
        if batch % tb == 0:
            return tb
        tb -= sublane
    return batch  # fall back: whole batch in one block (always legal: full-dim block)


def policy_distiller_ensemble_forward(specialist_outputs, params, action_dim: int):
    """specialist_outputs: list of E arrays, each (B, 2*action_dim). Returns (mu, log_sigma)."""
    A = action_dim
    E = len(specialist_outputs)
    B = specialist_outputs[0].shape[0]

    compute_dtype = params["w_blocks"].dtype
    specs = [o.astype(compute_dtype) for o in specialist_outputs]

    sublane = 16 if compute_dtype == jnp.bfloat16 else 8
    tb = _pick_block_rows(B, sublane)
    grid = (B // tb,)

    itemsize = jnp.dtype(compute_dtype).itemsize
    cost = pl.CostEstimate(
        flops=2 * B * (E * 2 * A) * (2 * A),
        transcendentals=B * A,
        bytes_accessed=(E * B * 2 * A + E * 2 * A * 2 * A) * itemsize
        + 2 * A * 4 + B * 2 * A * 4,
    )

    in_specs = (
        [pl.BlockSpec((tb, 2 * A), lambda i: (i, 0)) for _ in range(E)]
        + [pl.BlockSpec((E, 2 * A, 2 * A), lambda i: (0, 0, 0)),   # weight: resident
           pl.BlockSpec((1, 2 * A), lambda i: (0, 0))]             # bias: resident
    )
    out_specs = (
        pl.BlockSpec((tb, A), lambda i: (i, 0)),
        pl.BlockSpec((tb, A), lambda i: (i, 0)),
    )

    mu, log_sigma = pl.pallas_call(
        functools.partial(ensemble_head_kernel, ensemble_size=E, action_dim=A),
        grid=grid,
        in_specs=in_specs,
        out_specs=out_specs,
        out_shape=(jax.ShapeDtypeStruct((B, A), jnp.float32),
                   jax.ShapeDtypeStruct((B, A), jnp.float32)),
        compiler_params=pltpu.CompilerParams(
            dimension_semantics=("parallel",),
            vmem_limit_bytes=16 * 1024 * 1024),
        cost_estimate=cost,
    )(*specs, params["w_blocks"], params["bias"])

    return mu, log_sigma


def _reference_forward(spec_outs, mlp_weight, mlp_bias, A):
    """Pure-JAX f32 mirror of the PyTorch forward (stack/view/cat/Linear/tanh/clamp)."""
    B = spec_outs[0].shape[0]
    mus = jnp.stack([o[:, :A] for o in spec_outs], axis=-1).reshape(B, -1)
    lss = jnp.stack([o[:, A:] for o in spec_outs], axis=-1).reshape(B, -1)
    agg = jnp.concatenate([mus, lss], axis=-1) @ mlp_weight.T + mlp_bias
    return jnp.tanh(agg[:, :A]), jnp.clip(agg[:, A:], -20.0, 2.0)


if __name__ == "__main__":
    batch, seq_len, state_dim = 4, 8, 16
    action_dim, ensemble_size = 4, 3

    key = jax.random.PRNGKey(0)
    k_state, k_t, k_w, k_b, k_spec = jax.random.split(key, 5)

    state = jax.random.normal(k_state, (batch, seq_len, state_dim), jnp.float32)
    time_step = jax.random.uniform(k_t, (batch,), jnp.float32)

    # TODO(synk): the specialist policies are arbitrary external nn.Modules with no
    # fixed architecture; stand-in linear policies (pure JAX) produce the
    # (B, 2*action_dim) outputs the ensemble head consumes.
    pooled = jnp.mean(state, axis=1)                               # (B, state_dim)
    specialist_outputs = []
    for ks in jax.random.split(k_spec, ensemble_size):
        kw, kb = jax.random.split(ks)
        ws = jax.random.normal(kw, (state_dim, 2 * action_dim), jnp.float32) * 0.1
        bs = jax.random.normal(kb, (2 * action_dim,), jnp.float32) * 0.1
        specialist_outputs.append(jnp.tanh(pooled @ ws + bs) + 0.01 * time_step[:, None])

    # nn.Linear(action_dim * ensemble_size * 2, action_dim * 2) parameters.
    mlp_weight = jax.random.normal(
        k_w, (2 * action_dim, 2 * action_dim * ensemble_size), jnp.float32) * 0.2
    mlp_bias = jax.random.normal(k_b, (2 * action_dim,), jnp.float32) * 3.0  # exercise the clamp

    params = prepare_mlp_params(mlp_weight, mlp_bias, action_dim, ensemble_size,
                                compute_dtype=jnp.bfloat16)
    mu, log_sigma = policy_distiller_ensemble_forward(specialist_outputs, params, action_dim)
    jax.block_until_ready((mu, log_sigma))

    mu_ref, ls_ref = _reference_forward(specialist_outputs, mlp_weight, mlp_bias, action_dim)
    assert mu.shape == (batch, action_dim) and log_sigma.shape == (batch, action_dim)
    # bf16 inputs/weights (f32 accumulation) -> compare at bf16 tolerance.
    assert jnp.allclose(mu, mu_ref, atol=5e-2, rtol=5e-2)
    assert jnp.allclose(log_sigma, ls_ref, atol=5e-2, rtol=5e-2)
    print("KERNEL_OK")
</pallas_src>

<mosaic_0001>
module attributes {stable_mosaic.version = 11 : i64} {
  func.func @ensemble_head_kernel(%arg0: i32, %arg1: memref<4x8xbf16, #tpu.memory_space<vmem>>, %arg2: memref<4x8xbf16, #tpu.memory_space<vmem>>, %arg3: memref<4x8xbf16, #tpu.memory_space<vmem>>, %arg4: memref<3x8x8xbf16, #tpu.memory_space<vmem>>, %arg5: memref<1x8xf32, #tpu.memory_space<vmem>>, %arg6: memref<4x4xf32, #tpu.memory_space<vmem>>, %arg7: memref<4x4xf32, #tpu.memory_space<vmem>>) attributes {dimension_semantics = [#tpu.dimension_semantics<parallel>], iteration_bounds = array<i64: 1>, scalar_prefetch = 0 : i64, scratch_operands = 0 : i64, tpu.core_type = #tpu.core_type<tc>, window_params = [{transform_indices = @transform_0, window_bounds = array<i64: 4, 8>}, {transform_indices = @transform_1, window_bounds = array<i64: 4, 8>}, {transform_indices = @transform_2, window_bounds = array<i64: 4, 8>}, {pipeline_mode = #tpu.pipeline_mode<synchronous>, transform_indices = @transform_3, window_bounds = array<i64: 3, 8, 8>}, {pipeline_mode = #tpu.pipeline_mode<synchronous>, transform_indices = @transform_4, window_bounds = array<i64: 1, 8>}, {transform_indices = @transform_5, window_bounds = array<i64: 4, 4>}, {transform_indices = @transform_6, window_bounds = array<i64: 4, 4>}]} {
    %c0 = arith.constant 0 : index
    %c0_0 = arith.constant 0 : index
    %0 = vector.load %arg1[%c0, %c0_0] : memref<4x8xbf16, #tpu.memory_space<vmem>>, vector<4x8xbf16>
    %c0_1 = arith.constant 0 : index
    %c0_2 = arith.constant 0 : index
    %c0_3 = arith.constant 0 : index
    %1 = vector.load %arg4[%c0_1, %c0_2, %c0_3] : memref<3x8x8xbf16, #tpu.memory_space<vmem>>, vector<1x8x8xbf16>
    %2 = vector.shape_cast %1 : vector<1x8x8xbf16> to vector<8x8xbf16>
    %cst = arith.constant dense<0.000000e+00> : vector<4x8xf32>
    %3 = tpu.matmul %0, %2, %cst {dimension_numbers = #tpu.dot_dimension_numbers<[1], [0], [0], [1], [0, 0, 1, 1], [], []>} : vector<4x8xbf16>, vector<8x8xbf16>, vector<4x8xf32> -> vector<4x8xf32>
    %c0_4 = arith.constant 0 : index
    %c0_5 = arith.constant 0 : index
    %4 = vector.load %arg2[%c0_4, %c0_5] : memref<4x8xbf16, #tpu.memory_space<vmem>>, vector<4x8xbf16>
    %c1 = arith.constant 1 : index
    %c0_6 = arith.constant 0 : index
    %c0_7 = arith.constant 0 : index
    %5 = vector.load %arg4[%c1, %c0_6, %c0_7] : memref<3x8x8xbf16, #tpu.memory_space<vmem>>, vector<1x8x8xbf16>
    %6 = vector.shape_cast %5 : vector<1x8x8xbf16> to vector<8x8xbf16>
    %cst_8 = arith.constant dense<0.000000e+00> : vector<4x8xf32>
    %7 = tpu.matmul %4, %6, %cst_8 {dimension_numbers = #tpu.dot_dimension_numbers<[1], [0], [0], [1], [0, 0, 1, 1], [], []>} : vector<4x8xbf16>, vector<8x8xbf16>, vector<4x8xf32> -> vector<4x8xf32>
    %8 = arith.addf %3, %7 : vector<4x8xf32>
    %c0_9 = arith.constant 0 : index
    %c0_10 = arith.constant 0 : index
    %9 = vector.load %arg3[%c0_9, %c0_10] : memref<4x8xbf16, #tpu.memory_space<vmem>>, vector<4x8xbf16>
    %c2 = arith.constant 2 : index
    %c0_11 = arith.constant 0 : index
    %c0_12 = arith.constant 0 : index
    %10 = vector.load %arg4[%c2, %c0_11, %c0_12] : memref<3x8x8xbf16, #tpu.memory_space<vmem>>, vector<1x8x8xbf16>
    %11 = vector.shape_cast %10 : vector<1x8x8xbf16> to vector<8x8xbf16>
    %cst_13 = arith.constant dense<0.000000e+00> : vector<4x8xf32>
    %12 = tpu.matmul %9, %11, %cst_13 {dimension_numbers = #tpu.dot_dimension_numbers<[1], [0], [0], [1], [0, 0, 1, 1], [], []>} : vector<4x8xbf16>, vector<8x8xbf16>, vector<4x8xf32> -> vector<4x8xf32>
    %13 = arith.addf %8, %12 : vector<4x8xf32>
    %c0_14 = arith.constant 0 : index
    %c0_15 = arith.constant 0 : index
    %14 = vector.load %arg5[%c0_14, %c0_15] : memref<1x8xf32, #tpu.memory_space<vmem>>, vector<1x8xf32>
    %15 = vector.broadcast %14 : vector<1x8xf32> to vector<4x8xf32>
    %16 = arith.addf %13, %15 : vector<4x8xf32>
    %17 = vector.extract_strided_slice %16 {offsets = [0, 0], sizes = [4, 4], strides = [1, 1]} : vector<4x8xf32> to vector<4x4xf32>
    %18 = math.tanh %17 : vector<4x4xf32>
    %c0_16 = arith.constant 0 : index
    %c0_17 = arith.constant 0 : index
    %19 = vector.load %arg6[%c0_16, %c0_17] : memref<4x4xf32, #tpu.memory_space<vmem>>, vector<4x4xf32>
    tpu.vector_store %arg6[%c0_16, %c0_17], %18 {strides = array<i32>} : memref<4x4xf32, #tpu.memory_space<vmem>>, vector<4x4xf32>,
    %20 = vector.extract_strided_slice %16 {offsets = [0, 4], sizes = [4, 4], strides = [1, 1]} : vector<4x8xf32> to vector<4x4xf32>
    %cst_18 = arith.constant -2.000000e+01 : f32
    %cst_19 = arith.constant 2.000000e+00 : f32
    %21 = vector.broadcast %cst_18 : f32 to vector<4x4xf32>
    %22 = arith.maximumf %21, %20 : vector<4x4xf32>
    %23 = vector.broadcast %cst_19 : f32 to vector<4x4xf32>
    %24 = arith.minimumf %23, %22 : vector<4x4xf32>
    %c0_20 = arith.constant 0 : index
    %c0_21 = arith.constant 0 : index
    %25 = vector.load %arg7[%c0_20, %c0_21] : memref<4x4xf32, #tpu.memory_space<vmem>>, vector<4x4xf32>
    tpu.vector_store %arg7[%c0_20, %c0_21], %24 {strides = array<i32>} : memref<4x4xf32, #tpu.memory_space<vmem>>, vector<4x4xf32>,
    return
  }
  func.func @transform_0(%arg0: i32) -> (i32, i32) {
    %c0_i32 = arith.constant 0 : i32
    %c0_i32_0 = arith.constant 0 : i32
    return %arg0, %c0_i32 : i32, i32
  }
  func.func @transform_1(%arg0: i32) -> (i32, i32) {
    %c0_i32 = arith.constant 0 : i32
    %c0_i32_0 = arith.constant 0 : i32
    return %arg0, %c0_i32 : i32, i32
  }
  func.func @transform_2(%arg0: i32) -> (i32, i32) {
    %c0_i32 = arith.constant 0 : i32
    %c0_i32_0 = arith.constant 0 : i32
    return %arg0, %c0_i32 : i32, i32
  }
  func.func @transform_3(%arg0: i32) -> (i32, i32, i32) {
    %c0_i32 = arith.constant 0 : i32
    %c0_i32_0 = arith.constant 0 : i32
    %c0_i32_1 = arith.constant 0 : i32
    %c0_i32_2 = arith.constant 0 : i32
    return %c0_i32, %c0_i32_0, %c0_i32_1 : i32, i32, i32
  }
  func.func @transform_4(%arg0: i32) -> (i32, i32) {
    %c0_i32 = arith.constant 0 : i32
    %c0_i32_0 = arith.constant 0 : i32
    %c0_i32_1 = arith.constant 0 : i32
    return %c0_i32, %c0_i32_0 : i32, i32
  }
  func.func @transform_5(%arg0: i32) -> (i32, i32) {
    %c0_i32 = arith.constant 0 : i32
    %c0_i32_0 = arith.constant 0 : i32
    return %arg0, %c0_i32 : i32, i32
  }
  func.func @transform_6(%arg0: i32) -> (i32, i32) {
    %c0_i32 = arith.constant 0 : i32
    %c0_i32_0 = arith.constant 0 : i32
    return %arg0, %c0_i32 : i32, i32
  }
}

</mosaic_0001>

<bundles_post_ra>
// kernel: tpu_custom_call.1
= control target key start
LH: loop header
LB: loop body
LE: loop exit
PB: predicated region body
PF: predicated region fallthrough
CT: control target
= control target key end

     0   :  { %12 = vsyncpa [#allocation3], 0  ;;  %s496_s0 = inlined_call_operand.hbm [shape: bf16[4,8], index: 0, kind: input, shape index: {}]   ;;  %s497_s1 = inlined_call_operand.vmem [shape: bf16[4,8], index: 1, kind: input, shape index: {}]   ;;  %s498_s2 = inlined_call_operand.vmem [shape: bf16[4,8], index: 2, kind: input, shape index: {}]   ;;  %s499_s3 = inlined_call_operand.hbm [shape: bf16[3,8,8], index: 3, kind: input, shape index: {}]   ;;  %s500_s4 = inlined_call_operand.vmem [shape: f32[1,8], index: 4, kind: input, shape index: {}]   ;;  %s501_s5 = inlined_call_operand.hbm [shape: f32[4,4], index: 5, kind: output, shape index: {0}]   ;;  %s502_s6 = inlined_call_operand.hbm [shape: f32[4,4], index: 6, kind: output, shape index: {1}]  }
   0x1   :  { %13 = vsyncpa [#allocation6], 0 }
   0x2   :  { %14 = vsyncpa [#allocation4], 0 }
   0x3   :  { %15 = vsyncpa [#allocation9], 0  ;;  %s383_s21 = smov [#allocation2]   ;;  %s384_s23 = smov [#allocation5]  }
   0x4   :  { %s22_s22 = sshll.u32 %s383_s21, 4  ;;  %s35_s24 = sshll.u32 %s384_s23, 4  ;;  %s23_s22 = int_to_ptr.vmem [resolvable:$true] %s22_s22  ;;  %s427_s24 = int_to_ptr.vmem [resolvable:$true] %s35_s24 }
   0x5   :  { %s287_s27 = scalar_lea.hbm %s496_s0, 32 }
   0x6   :  { %p288_p0 = scmp.ne.s32.totalorder %s496_s0, %s287_s27  ;;  %p291_p1 = scmp.lt.u32.totalorder %s287_s27, %s496_s0 }
   0x8   :  { %p293_p2 = pnand %p291_p1, %p288_p0 }
   0xa   :  { %296 = shalt.err (!%p293_p2)
}
   0xb   :  { %s297_s8 = scalar_lea.vmem %s23_s22, 32  ;;  %p302_p4 = scmp.lt.s32.totalorder %s23_s22, %s23_s22 }
   0xc   :  { %p298_p3 = scmp.ne.s32.totalorder %s23_s22, %s297_s8  ;;  %p303_p5 = scmp.lt.s32.totalorder %s297_s8, %s297_s8 }
   0xe   :  { %p304_p6 = por %p303_p5, %p302_p4 }
  0x10   :  { %p305_p7 = pnand %p304_p6, %p298_p3 }
  0x12   :  { %308 = shalt.err (!%p305_p7)
}
  0x13   :  { %25 = dma.hbm_to_vmem [thread:$0]  %s496_s0, 32, %s23_s22, [#allocation3]  }
  0x14   :  { %s309_s13 = scalar_lea.hbm %s499_s3, 192 }
  0x15   :  { %p310_p8 = scmp.ne.s32.totalorder %s499_s3, %s309_s13  ;;  %p313_p9 = scmp.lt.u32.totalorder %s309_s13, %s499_s3 }
  0x17   :  { %p315_p10 = pnand %p313_p9, %p310_p8 }
  0x19   :  { %318 = shalt.err (!%p315_p10)
}
  0x1a   :  { %s319_s18 = scalar_lea.vmem %s427_s24, 192  ;;  %p324_p12 = scmp.lt.s32.totalorder %s427_s24, %s427_s24 }
  0x1b   :  { %p320_p11 = scmp.ne.s32.totalorder %s427_s24, %s319_s18  ;;  %p325_p13 = scmp.lt.s32.totalorder %s319_s18, %s319_s18 }
  0x1d   :  { %p326_p0 = por %p325_p13, %p324_p12 }
  0x1f   :  { %p327_p1 = pnand %p326_p0, %p320_p11 }
  0x21   :  { %330 = shalt.err (!%p327_p1)
}
  0x22   :  { %s385_s0 = smov 64   ;;  %s386_s19 = smov 4  }
  0x23   :  { %41 = dma.hbm_to_vmem [thread:$0]  %s499_s3, 192, %s427_s24, [#allocation6], %s385_s0, %s385_s0, %s386_s19  }
  0x24   :  { %375 = dma.done.wait [#allocation3], 32  }
  0x25   :  { %376 = vsyncadd [#allocation3], 4294967264 }
  0x26   :  { %377 = dma.done.wait [#allocation6], 192  }
  0x27   :  { %378 = vsyncadd [#allocation6], 4294967104  ;;  %v387_v0 = vmov 0.0   ;;  %vm388_vm0 = vmmov 0   ;;  %vm60_vm1 = vcmask 1043456   ;;  %vm56_vm2 = vcmask 64512  }
  0x28   :  { %258 = vmatprep.subr.bf16.mxu0 %v387_v0  ;;  %264 = vmatprep.subr.bf16.mxu1 %v387_v0  ;;  %v55_v1 = vld [vmem:[#allocation5 + $0x4] sm:$0xf]  ;;  %v52_v2 = vld [vmem:[#allocation5] sm:$0xf]  ;;  %v152_v5 = vld [vmem:[#allocation5 + $0x8] sm:$0xf] }
  0x29   :  { %260 = vmatprep.mubr.msk.bf16.mxu0 %vm388_vm0, %v387_v0  ;;  %266 = vmatprep.mubr.msk.bf16.mxu1 %vm388_vm0, %v387_v0  ;;  %v62_v3 = vsel %vm60_vm1, %v55_v1, 0  ;;  %v108_v4 = vsel %vm60_vm1, %v52_v2, 0  ;;  %v53_v6 = vld [vmem:[%s497_s1] sm:$0x3]  ;;  %v157_v8 = vsel %vm60_vm1, %v152_v5, 0  ;;  %s390_s26 = smov [#allocation7]  }
  0x2a   :  { %259 = vmatpush3.bf16.msra.mxu0 %v62_v3  ;;  %265 = vmatpush3.bf16.msra.mxu1 %v108_v4  ;;  %v51_v7 = vld [vmem:[#allocation2] sm:$0x3]  ;;  %s224_s27 = sshll.u32 %s390_s26, 4  ;;  %vm209_vm3 = vcmask 27648   ;;  %s225_s27 = int_to_ptr.vmem [resolvable:$true] %s224_s27 }
  0x2b   :  { %270 = vmatprep.subr.bf16.mxu0 %v387_v0  ;;  %v150_v9 = vld [vmem:[%s498_s2] sm:$0x3]  ;;  %s389_s2 = smov 124   ;;  %s331_s28 = scalar_lea.vmem %s225_s27, 64 }
  0x2c   :  { %v251_v20 = vld [vmem:[%s500_s4] ss:$0 sm:$0xff]  ;;  %p332_p2 = scmp.ne.s32.totalorder %s225_s27, %s331_s28  ;;  %p336_p3 = scmp.lt.s32.totalorder %s225_s27, %s225_s27 }
  0x2d   :  { %261 = vmatmul.mubr.msk.bf16.vlgmr.msra.gmra.mrb[0].mxu0 %vm56_vm2, %v53_v6  ;;  %267 = vmatmul.mubr.msk.bf16.vlgmr.msra.gmra.mrb[0].mxu1 %vm56_vm2, %v51_v7  ;;  %p337_p4 = scmp.lt.s32.totalorder %s331_s28, %s331_s28 }
  0x2e   :  { %271 = vmatpush3.bf16.msra.mxu0 %v157_v8  ;;  %272 = vmatprep.mubr.msk.bf16.mxu0 %vm388_vm0, %v387_v0 }
  0x2f   :  { %p338_p5 = por %p337_p4, %p336_p3 }
  0x31   :  { %p339_p6 = pnand %p338_p5, %p332_p2 }
  0x35   :  { %273 = vmatmul.mubr.msk.bf16.vlgmr.msra.gmra.mrb[4].mxu0 %vm56_vm2, %v150_v9 }
 0x100   :  { %v98_v10 = vpop.f32.mrb[0].mxu0  ;;  %v144_v11 = vpop.f32.mrb[0].mxu1 }
 0x101   :  { %v262_v12 = vpop.f32.mrb[1].mxu0  ;;  %v145_v13 = vadd.f32 %v144_v11, %v98_v10  ;;  %v268_v14 = vpop.f32.mrb[1].mxu1 }
 0x102   :  { %v101_v15 = vpop.f32.mrb[2].mxu0  ;;  %v147_v16 = vpop.f32.mrb[2].mxu1 }
 0x103   :  { %v263_v17 = vpop.f32.mrb[3].mxu0  ;;  %v269_v18 = vpop.f32.mrb[3].mxu1 }
 0x108   :  { %v193_v19 = vpop.f32.mrb[4].mxu0 }
 0x109   :  { %v199_v21 = vadd.f32 %v193_v19, %v145_v13  ;;  %v274_v22 = vpop.f32.mrb[5].mxu0 }
 0x10a   :  { %v196_v23 = vpop.f32.mrb[6].mxu0 }
 0x10b   :  { %v207_v24 = vadd.f32 %v251_v20, %v199_v21  ;;  %v275_v25 = vpop.f32.mrb[7].mxu0 }
 0x10d   :  { %285 = vtanh.f32 %v207_v24  ;;  %v211_v26 = vmax.f32 %v207_v24, -20.0 }
 0x10f   :  { %v212_v27 = vmin.f32 %v211_v26, 2.0 }
 0x111   :  { %214 = vrot.lane.b32.xlu0 %v212_v27, %s389_s2 }
 0x117   :  { %v286_v28 = vpop.eup %285 }
 0x118   :  { %210 = vst.msk [vmem:[#allocation7] sm:$0xf] %vm209_vm3, %v286_v28 }
 0x119   :  { %342 = shalt.err (!%p339_p6)
}
 0x11a   :  { %s343_s30 = scalar_lea.hbm %s501_s5, 64 }
 0x11b   :  { %p344_p7 = scmp.ne.s32.totalorder %s501_s5, %s343_s30  ;;  %p347_p8 = scmp.lt.u32.totalorder %s343_s30, %s501_s5 }
 0x11d   :  { %p349_p9 = pnand %p347_p8, %p344_p7 }
 0x11f   :  { %352 = shalt.err (!%p349_p9)
}
 0x120   :  { %227 = dma.vmem_to_hbm [thread:$0]  %s225_s27, 64, %s501_s5, [#allocation4]  }
 0x121   :  { %s391_s13 = smov [#allocation8]  }
 0x122   :  { %s234_s14 = sshll.u32 %s391_s13, 4  ;;  %s235_s14 = int_to_ptr.vmem [resolvable:$true] %s234_s14 }
 0x123   :  { %s353_s15 = scalar_lea.vmem %s235_s14, 64  ;;  %p358_p11 = scmp.lt.s32.totalorder %s235_s14, %s235_s14 }
 0x124   :  { %p354_p10 = scmp.ne.s32.totalorder %s235_s14, %s353_s15  ;;  %p359_p12 = scmp.lt.s32.totalorder %s353_s15, %s353_s15 }
 0x126   :  { %p360_p13 = por %p359_p12, %p358_p11 }
 0x128   :  { %p361_p0 = pnand %p360_p13, %p354_p10 }
 0x183   :  { %v215_v29 = vpop.permute.xlu0 %214 }
 0x184   :  { %217 = vst.msk [vmem:[#allocation8] sm:$0xf] %vm209_vm3, %v215_v29 }
 0x185   :  { %364 = shalt.err (!%p361_p0)
}
 0x186   :  { %s365_s18 = scalar_lea.hbm %s502_s6, 64 }
 0x187   :  { %p366_p1 = scmp.ne.s32.totalorder %s502_s6, %s365_s18  ;;  %p369_p2 = scmp.lt.u32.totalorder %s365_s18, %s502_s6 }
 0x189   :  { %p371_p3 = pnand %p369_p2, %p366_p1 }
 0x18b   :  { %374 = shalt.err (!%p371_p3)
}
 0x18c   :  { %237 = dma.vmem_to_hbm [thread:$0]  %s235_s14, 64, %s502_s6, [#allocation9]  }
 0x18d   :  { %379 = dma.done.wait [#allocation4], 64  }
 0x18e   :  { %380 = vsyncadd [#allocation4], 4294967232 }
 0x18f   :  { %381 = dma.done.wait [#allocation9], 64  }
 0x190   :  { %382 = vsyncadd [#allocation9], 4294967232 }
 0x191   :  { %244 = vsyncpa [#allocation3], 1 }
 0x192   :  { %245 = vsyncpa [#allocation6], 1 }
 0x193   :  { %246 = vsyncpa [#allocation4], 1 }
 0x194   :  { %247 = vsyncpa [#allocation9], 1 }

</bundles_post_ra>
